<compile_context>
chip_gen: v7x
topology: tpu7x:2x2x1
jax: 0.10.0
libtpu: 0.0.40
codegen_flags: <defaults>
</compile_context>

<pallas_src>
import functools

import jax
import jax.numpy as jnp
from jax.experimental import pallas as pl
from jax.experimental.pallas import tpu as pltpu


def _model_kernel(u_ref, x_ref, out_ref, *, inv_batch):
    # u_ref   : VMEM (1, TS, S) f32  -- uniform [0, 1) random block
    # x_ref   : VMEM (1, S, D)  bf16 -- one batch's input slab, resident across
    #                                   the inner row-tile axis
    # out_ref : VMEM (1, TS, D) f32  -- one (batch, row-tile) of the output
    u = u_ref[0]                                        # (TS, S) f32

    # w0 = 0.2*u - 0.1. softmax is shift-invariant and 0.2*u in [0, 0.2)
    # cannot overflow exp, so both the max-subtraction and the -0.1 shift are
    # dropped: exp(0.2*u) has the same softmax as w0.
    e = jnp.exp(u * 0.2)                                # f32 (VPU/EUP)
    denom = jnp.sum(e, axis=-1, keepdims=True)          # f32 row sums (TS, 1)

    # Softmax numerator @ x on the MXU (bf16 in, f32 accumulate). The softmax
    # normalisation and the 1/B factor (reference per-slice L1 norm == B) are
    # folded into a single scale applied to the much smaller (TS, D) tile.
    acc = jnp.dot(e.astype(jnp.bfloat16), x_ref[0],
                  preferred_element_type=jnp.float32)   # (TS, D) f32
    out_ref[0] = (acc * (inv_batch / denom)).astype(out_ref.dtype)


def model_forward(x, attn_mask, key, *, tile_s=256):
    # attn_mask (and the x @ x^T term) only determine the shape of the random
    # weight tensor in the reference model; their values are dead.
    del attn_mask
    B, S, D = x.shape
    tile_s = min(tile_s, S)
    assert S % tile_s == 0, "seq length must divide the row tile"

    # w0 = torch.empty_like(v).uniform_(-0.1, 0.1) -> drawn host/XLA-side.
    # TODO(synk): torch's .uniform_ RNG stream has no bit-exact JAX equivalent;
    # the distribution matches but not the exact bits.
    u = jax.random.uniform(key, (B, S, S), dtype=jnp.float32)   # [0, 1)

    # MXU consumes bf16 anyway; casting here halves the resident slab's DMA
    # and VMEM footprint and removes a per-tile in-kernel cast.
    x_bf16 = x.astype(jnp.bfloat16)

    kernel = functools.partial(_model_kernel, inv_batch=1.0 / B)

    grid_spec = pltpu.PrefetchScalarGridSpec(
        num_scalar_prefetch=0,
        grid=(B, S // tile_s),
        in_specs=[
            # Uniform block for this (batch, row-tile).
            pl.BlockSpec((1, tile_s, S), lambda b, s: (b, s, 0)),
            # Full (S, D) slab of this batch; block index constant across the
            # inner s axis, so the DMA is not re-issued per row tile.
            pl.BlockSpec((1, S, D), lambda b, s: (b, 0, 0)),
        ],
        out_specs=pl.BlockSpec((1, tile_s, D), lambda b, s: (b, s, 0)),
    )

    return pl.pallas_call(
        kernel,
        out_shape=jax.ShapeDtypeStruct((B, S, D), jnp.float32),
        grid_spec=grid_spec,
        compiler_params=pltpu.CompilerParams(
            # Every output tile is independent -> megacore-shardable.
            dimension_semantics=("parallel", "parallel")),
    )(u, x_bf16)


if __name__ == "__main__":
    # Lane-dense small shapes: D multiple of 128, row tiles multiple of 8.
    B, S, D = 4, 256, 128

    key = jax.random.PRNGKey(0)
    kx, kw = jax.random.split(key)
    x = jax.random.normal(kx, (B, S, D), dtype=jnp.float32)   # torch.randn
    attn_mask = jnp.zeros((B, D), dtype=jnp.float32)          # torch.zeros

    out = model_forward(x, attn_mask, kw)
    jax.block_until_ready(out)

    assert out.shape == (B, S, D) and out.dtype == jnp.float32
    assert bool(jnp.all(jnp.isfinite(out)))

    # Pure-JAX reference computed from the same uniform draw.
    u = jax.random.uniform(kw, (B, S, S), dtype=jnp.float32)
    w = jax.nn.softmax(u * 0.2 - 0.1, axis=-1)
    ref = jnp.einsum("bqk,bkd->bqd", w, x) / B
    err = float(jnp.max(jnp.abs(out - ref)))
    assert err < 1e-2, f"max abs error {err}"

    # Each output row times B is a convex combination of that batch's input
    # rows (softmax weights sum to 1), so it must lie inside the per-column
    # min/max hull of x[b] up to bf16 rounding.
    hi = jnp.max(x, axis=1, keepdims=True)
    lo = jnp.min(x, axis=1, keepdims=True)
    scaled = out * B
    tol = 5e-2
    assert bool(jnp.all(scaled <= hi + tol))
    assert bool(jnp.all(scaled >= lo - tol))
    print("KERNEL_OK")
</pallas_src>

<mosaic_0001>
module attributes {stable_mosaic.version = 11 : i64} {
  func.func @_model_kernel(%arg0: i32, %arg1: i32, %arg2: memref<1x256x256xf32, #tpu.memory_space<vmem>>, %arg3: memref<1x256x128xbf16, #tpu.memory_space<vmem>>, %arg4: memref<1x256x128xf32, #tpu.memory_space<vmem>>) attributes {dimension_semantics = [#tpu.dimension_semantics<parallel>, #tpu.dimension_semantics<parallel>], iteration_bounds = array<i64: 4, 1>, scalar_prefetch = 0 : i64, scratch_operands = 0 : i64, tpu.core_type = #tpu.core_type<tc>, window_params = [{transform_indices = @transform_0, window_bounds = array<i64: 1, 256, 256>}, {transform_indices = @transform_1, window_bounds = array<i64: 1, 256, 128>}, {transform_indices = @transform_2, window_bounds = array<i64: 1, 256, 128>}]} {
    %c0 = arith.constant 0 : index
    %c0_0 = arith.constant 0 : index
    %c0_1 = arith.constant 0 : index
    %0 = vector.load %arg2[%c0, %c0_0, %c0_1] : memref<1x256x256xf32, #tpu.memory_space<vmem>>, vector<1x256x256xf32>
    %1 = vector.shape_cast %0 : vector<1x256x256xf32> to vector<256x256xf32>
    %cst = arith.constant 2.000000e-01 : f32
    %2 = vector.broadcast %cst : f32 to vector<256x256xf32>
    %3 = arith.mulf %1, %2 : vector<256x256xf32>
    %4 = math.exp %3 : vector<256x256xf32>
    %cst_2 = arith.constant dense<0.000000e+00> : vector<256xf32>
    %5 = vector.multi_reduction <add>, %4, %cst_2 [1] : vector<256x256xf32> to vector<256xf32>
    %6 = vector.shape_cast %5 : vector<256xf32> to vector<256x1xf32>
    %7 = arith.truncf %4 : vector<256x256xf32> to vector<256x256xbf16>
    %c0_3 = arith.constant 0 : index
    %c0_4 = arith.constant 0 : index
    %c0_5 = arith.constant 0 : index
    %8 = vector.load %arg3[%c0_3, %c0_4, %c0_5] : memref<1x256x128xbf16, #tpu.memory_space<vmem>>, vector<1x256x128xbf16>
    %9 = vector.shape_cast %8 : vector<1x256x128xbf16> to vector<256x128xbf16>
    %cst_6 = arith.constant dense<0.000000e+00> : vector<256x128xf32>
    %10 = tpu.matmul %7, %9, %cst_6 {dimension_numbers = #tpu.dot_dimension_numbers<[1], [0], [0], [1], [0, 0, 1, 1], [], []>} : vector<256x256xbf16>, vector<256x128xbf16>, vector<256x128xf32> -> vector<256x128xf32>
    %cst_7 = arith.constant 2.500000e-01 : f32
    %11 = vector.broadcast %cst_7 : f32 to vector<256x1xf32>
    %12 = arith.divf %11, %6 : vector<256x1xf32>
    %13 = vector.broadcast %12 : vector<256x1xf32> to vector<256x128xf32>
    %14 = arith.mulf %10, %13 : vector<256x128xf32>
    %c0_8 = arith.constant 0 : index
    %c0_9 = arith.constant 0 : index
    %c0_10 = arith.constant 0 : index
    %15 = vector.load %arg4[%c0_8, %c0_9, %c0_10] : memref<1x256x128xf32, #tpu.memory_space<vmem>>, vector<1x256x128xf32>
    %16 = vector.shape_cast %15 : vector<1x256x128xf32> to vector<256x128xf32>
    %17 = vector.shape_cast %14 : vector<256x128xf32> to vector<1x256x128xf32>
    tpu.vector_store %arg4[%c0_8, %c0_9, %c0_10], %17 {strides = array<i32>} : memref<1x256x128xf32, #tpu.memory_space<vmem>>, vector<1x256x128xf32>,
    return
  }
  func.func @transform_0(%arg0: i32, %arg1: i32) -> (i32, i32, i32) {
    %c0_i32 = arith.constant 0 : i32
    %c0_i32_0 = arith.constant 0 : i32
    return %arg0, %arg1, %c0_i32 : i32, i32, i32
  }
  func.func @transform_1(%arg0: i32, %arg1: i32) -> (i32, i32, i32) {
    %c0_i32 = arith.constant 0 : i32
    %c0_i32_0 = arith.constant 0 : i32
    %c0_i32_1 = arith.constant 0 : i32
    return %arg0, %c0_i32, %c0_i32_0 : i32, i32, i32
  }
  func.func @transform_2(%arg0: i32, %arg1: i32) -> (i32, i32, i32) {
    %c0_i32 = arith.constant 0 : i32
    %c0_i32_0 = arith.constant 0 : i32
    return %arg0, %arg1, %c0_i32 : i32, i32, i32
  }
}

</mosaic_0001>

<bundles_post_ra>
// kernel: tpu_custom_call.1
= control target key start
LH: loop header
LB: loop body
LE: loop exit
PB: predicated region body
PF: predicated region fallthrough
CT: control target
= control target key end

     0   :  { %7 = vsyncpa [#allocation3], 0  ;;  %s2268_s0 = inlined_call_operand.hbm [shape: f32[4,256,256], index: 0, kind: input, shape index: {}]   ;;  %s2269_s1 = inlined_call_operand.hbm [shape: bf16[4,256,128], index: 1, kind: input, shape index: {}]   ;;  %s2270_s2 = inlined_call_operand.hbm [shape: f32[4,256,128], index: 2, kind: output, shape index: {}]  }
   0x1   :  { %9 = vsyncpa [#allocation3 + $0x1], 0 }
   0x2   :  { %10 = vsyncpa [#allocation6], 0 }
   0x3   :  { %12 = vsyncpa [#allocation6 + $0x1], 0 }
   0x4   :  { %13 = vsyncpa [#allocation4], 0 }
   0x5   :  { %15 = vsyncpa [#allocation4 + $0x1], 0  ;;  %s1770_s9 = smov 0   ;;  %s1772_s10 = smov 0  }
   0x6   :  { %s1774_s11 = smov 0   ;;  %s1776_s12 = smov 0  }
   0x7   :  { %s1778_s13 = smov 0   ;;  %s1780_s14 = smov 0  }
   0x8 LB: > { %s1151_s15 = sadd.s32 4294967295, %s1744_s14   ;;  %s1152_s16 = sadd.s32 4294967294, %s1744_s14   ;;  %s1744_s14 = sphi %s1780_s14, %s21_s14   ;;  %s1740_s13 = sphi %s1778_s13, %s2287_s13   ;;  %s1736_s12 = sphi %s1776_s12, %s2286_s12   ;;  %s1732_s11 = sphi %s1774_s11, %s2285_s11   ;;  %s1728_s10 = sphi %s1772_s10, %s2284_s10   ;;  %s1724_s9 = sphi %s1770_s9, %s2283_s9  }
   0x9   : > { %s33_s17 = sadd.s32 1, %s1740_s13  ;;  %s42_s18 = sadd.s32 1, %s1732_s11 }
   0xa   : > { %p35_p0 = scmp.ge.s32.totalorder %s33_s17, 4  ;;  %p49_p1 = scmp.ne.s32.totalorder %s1732_s11, %s1728_s10 }
   0xb   : > { %p50_p2 = scmp.eq.s32.totalorder %s1744_s14, 0  ;;  %p55_p3 = scmp.ne.s32.totalorder %s1728_s10, %s1724_s9 }
   0xc   : > { %s2289_s17 = smov (%p35_p0, %s33_s17), 0  ;;  %p56_p5 = scmp.eq.s32.totalorder %s1151_s15, 0 }
   0xd   : > { %p1811_p4 = por %p50_p2, %p49_p1  ;;  %s37_s20 = ssub.s32 %s1740_s13, %s2289_s17 }
   0xe   : > { %p107_p6 = scmp.eq.s32.totalorder %s1151_s15, 3  ;;  %p40_p7 = scmp.eq.s32.totalorder %s37_s20, 0 }
   0xf   : > { %p1817_p8 = por %p56_p5, %p55_p3  ;;  %p113_p10 = scmp.eq.s32.totalorder %s1152_s16, 3 }
  0x10   : > { %p1821_p9 = por %p107_p6, %p49_p1  ;;  %p1334_p12 = scmp.lt.s32.totalorder %s1744_s14, 4 }
  0x11   : > { %s2274_s21 = scalar_select %p1817_p8, 1, 0 }
  0x12   : > { %s2275_s22 = scalar_select %p1821_p9, 1, 0 }
  0x13   : > { %s1826_s23 = scalar_select %p40_p7, %s1732_s11, %s42_s18  }
  0x14   : > { %p1828_p11 = por %p113_p10, %p55_p3  ;;  %s1834_s25 = sand.u32 1, %s1732_s11  }
  0x15   : > { %s1155_s26 = sshll.u32 %s1834_s25, 9  ;;  %s1186_s27 = sshll.u32 %s1740_s13, 13 }
  0x16   : > { %s2276_s24 = scalar_select %p1828_p11, 1, 0 }
  0x17   : > { %s1841_s30 = scalar_lea.hbm %s2268_s0, %s1186_s27  ;;  %s137_s3 = scalar_lea.vmem [#allocation2], %s1155_s26 }
  0x18   : > { %s147_s4 = sshll.u32 %s137_s3, 4  ;;  %p1847_p13 = pnand %p1334_p12, %p1811_p4  ;;  %s1843_s4 = int_to_ptr.vmem [resolvable:$true] %s147_s4 }
  0x19   : > { %s134_s6 = scalar_lea.sflag [#allocation3], %s1834_s25  ;;  %s1598_s7 = scalar_lea.hbm %s1841_s30, 8192 }
  0x1a   : > { %p1599_p1 = scmp.ne.s32.totalorder %s1841_s30, %s1598_s7  ;;  %p1600_p2 = pneg %p1847_p13 }
  0x1b   : > { %s1603_s16 = scalar_lea.hbm %s2268_s0, 32768  ;;  %p1604_p4 = scmp.lt.u32.totalorder %s1841_s30, %s2268_s0 }
  0x1c   : > { %p1601_p3 = pnand %p1600_p2, %p1599_p1  ;;  %p1605_p6 = scmp.lt.u32.totalorder %s1603_s16, %s1598_s7 }
  0x1d   : > { %p1607_p10 = scmp.lt.u32.totalorder %s1598_s7, %s1841_s30 }
  0x1e   : > { %p1602_p5 = pneg %p1601_p3  ;;  %p1606_p7 = por %p1605_p6, %p1604_p4 }
  0x20   : > { %p1608_p12 = por %p1607_p10, %p1606_p7 }
  0x22   : > { %p1609_p0 = pnand %p1608_p12, %p1602_p5 }
  0x24   : > { %1612 = shalt.err (!%p1609_p0)
}
  0x25   : > { %s1613_s20 = scalar_lea.vmem %s1843_s4, 8192  ;;  %s1746_s26 = smov [#allocation2]  }
  0x26   : > { %p1614_p1 = scmp.ne.s32.totalorder %s1843_s4, %s1613_s20  ;;  %s1618_s27 = sshll.u32 %s1746_s26, 4  ;;  %s1619_s27 = int_to_ptr.vmem [resolvable:$false] %s1618_s27 }
  0x27   : > { %s1620_s28 = scalar_lea.vmem %s1619_s27, 16384  ;;  %p1621_p9 = scmp.lt.s32.totalorder %s1843_s4, %s1619_s27 }
  0x28   : > { %p1616_p3 = pnand %p1614_p1, %p1600_p2  ;;  %p1622_p4 = scmp.lt.s32.totalorder %s1620_s28, %s1613_s20 }
  0x2a   : > { %p1617_p11 = pneg %p1616_p3  ;;  %p1623_p6 = por %p1622_p4, %p1621_p9 }
  0x2c   : > { %p1624_p7 = pnand %p1623_p6, %p1617_p11 }
  0x2e   : > { %1627 = shalt.err (!%p1624_p7)
}
  0x2f   : > { %s1747_s29 = smov 256   ;;  %s1748_s3 = smov 16  }
  0x30   : > { %1326 = dma.hbm_to_vmem [thread:$0]  (!%p1847_p13), %s1841_s30, 8192, %s1843_s4, %s134_s6, %s1747_s29, %s1747_s29, %s1748_s3  }
  0x31   : > { %p176_p0 = scmp.lt.s32.totalorder %s1744_s14, 5  ;;  %s1158_s7 = sshll.u32 %s1834_s25, 7 }
  0x32   : > { %s1187_s8 = sshll.u32 %s1740_s13, 11  ;;  %p2278_p9 = scmp.ge.s32.totalorder %s1744_s14, 1 }
  0x33   : > { %s1892_s19 = scalar_lea.hbm %s2269_s1, %s1187_s8  ;;  %s161_s20 = scalar_lea.vmem [#allocation5], %s1158_s7 }
  0x34   : > { %p1885_p11 = pnand %p2278_p9, %p176_p0  ;;  %s168_s26 = sshll.u32 %s161_s20, 4  ;;  %s1894_s26 = int_to_ptr.vmem [resolvable:$true] %s168_s26 }
  0x35   : > { %s158_s30 = scalar_lea.sflag [#allocation6], %s1834_s25  ;;  %s1628_s4 = scalar_lea.hbm %s1892_s19, 2048 }
  0x36   : > { %p1629_p5 = scmp.ne.s32.totalorder %s1892_s19, %s1628_s4  ;;  %s1633_s28 = scalar_lea.hbm %s2269_s1, 8192 }
  0x37   : > { %p1634_p1 = scmp.lt.u32.totalorder %s1892_s19, %s2269_s1  ;;  %p1635_p3 = scmp.lt.u32.totalorder %s1633_s28, %s1628_s4 }
  0x38   : > { %p1631_p10 = pnand %p1629_p5, %p1600_p2  ;;  %p1637_p6 = scmp.lt.u32.totalorder %s1628_s4, %s1892_s19 }
  0x39   : > { %p1636_p4 = por %p1635_p3, %p1634_p1 }
  0x3a   : > { %p1632_p12 = pneg %p1631_p10 }
  0x3b   : > { %p1638_p7 = por %p1637_p6, %p1636_p4 }
  0x3d   : > { %p1639_p0 = pnand %p1638_p7, %p1632_p12 }
  0x3f   : > { %1642 = shalt.err (!%p1639_p0)
}
  0x40   : > { %s1643_s7 = scalar_lea.vmem %s1894_s26, 2048  ;;  %s1749_s8 = smov [#allocation5]  }
  0x41   : > { %p1644_p9 = scmp.ne.s32.totalorder %s1894_s26, %s1643_s7  ;;  %s1648_s16 = sshll.u32 %s1749_s8, 4  ;;  %s1649_s16 = int_to_ptr.vmem [resolvable:$false] %s1648_s16 }
  0x42   : > { %s1650_s18 = scalar_lea.vmem %s1649_s16, 4096  ;;  %p1651_p8 = scmp.lt.s32.totalorder %s1894_s26, %s1649_s16 }
  0x43   : > { %p1646_p5 = pnand %p1644_p9, %p1600_p2  ;;  %p1652_p1 = scmp.lt.s32.totalorder %s1650_s18, %s1643_s7 }
  0x45   : > { %p1647_p10 = pneg %p1646_p5  ;;  %p1653_p3 = por %p1652_p1, %p1651_p8 }
  0x47   : > { %p1654_p4 = pnand %p1653_p3, %p1647_p10 }
  0x49   : > { %1657 = shalt.err (!%p1654_p4)
}
  0x4a   : > { %s1750_s20 = smov 64   ;;  %s1751_s4 = smov 4  }
  0x4b   : > { %1329 = dma.hbm_to_vmem [thread:$0]  (!%p1847_p13), %s1892_s19, 2048, %s1894_s26, %s158_s30, %s1750_s20, %s1750_s20, %s1751_s4  }
  0x4c   : > { %180 = sbr.rel (%p1885_p11) target bundleno = 410 (0x19a), region = 28  ;;  %s1925_s6 = sand.u32 (!%p1885_p11), 1, %s1728_s10  }
  0x4d   : > { %s1162_s27 = sshll.u32 (!%p1885_p11), %s1925_s6, 9  ;;  %s183_s28 = scalar_lea.sflag (!%p1885_p11), [#allocation3], %s1925_s6 }
  0x4e   : > { %s1929_s29 = scalar_lea.vmem (!%p1885_p11), [#allocation2], %s1162_s27  ;;  %p2280_p8 = scmp.ne.s32.totalorder (!%p1885_p11), %s2274_s21, 0 }
  0x53   : > { %1711 = dma.done.wait (%p2280_p8), %s183_s28, 8192  }
  0x54   : > { %1713 = vsyncadd (%p2280_p8), %s183_s28, 4294959104  ;;  %s1163_s25 = sshll.u32 %s1925_s6, 7  ;;  %s192_s5 = scalar_lea.sflag [#allocation6], %s1925_s6 }
  0x55   : > { %s1937_s15 = scalar_lea.vmem [#allocation5], %s1163_s25 }
  0x56   : > { %1715 = dma.done.wait (%p2280_p8), %s192_s5, 2048  }
  0x57   : > { %1717 = vsyncadd (%p2280_p8), %s192_s5, 4294965248  ;;  %v1390_v0 = vld [vmem:[%s1937_s15 + $0x40] sm:$0xff]   ;;  %v1392_v2 = vld [vmem:[%s1937_s15 + $0x48] sm:$0xff]   ;;  %s1164_s21 = sshll.u32 %s1925_s6, 8  ;;  %s1188_s26 = sshll.u32 %s1736_s12, 12 }
  0x58   : > { %v1391_v1 = vld [vmem:[%s1937_s15] sm:$0xff]   ;;  %1189 = vmatprep.subr.bf16.mxu0 %v1390_v0  ;;  %1301 = vmatprep.subr.bf16.mxu1 %v1390_v0  ;;  %v1393_v3 = vld [vmem:[%s1937_s15 + $0x8] sm:$0xff]   ;;  %v1394_v4 = vld [vmem:[%s1937_s15 + $0x50] sm:$0xff]   ;;  %s2169_s19 = scalar_lea.vmem [#allocation7], %s1164_s21  ;;  %s2215_s8 = scalar_lea.hbm %s2270_s2, %s1188_s26 }
  0x59   : > { %1190 = vmatpush3.bf16.msra.mxu0 %v1391_v1  ;;  %1309 = vmatpush3.bf16.msra.mxu1 %v1391_v1  ;;  %v1395_v5 = vld [vmem:[%s1937_s15 + $0x10] sm:$0xff]   ;;  %v1396_v6 = vld [vmem:[%s1937_s15 + $0x58] sm:$0xff]   ;;  %v1398_v8 = vld [vmem:[%s1937_s15 + $0x60] sm:$0xff]   ;;  %s1041_s30 = sshll.u32 %s2169_s19, 4  ;;  %s1026_s12 = scalar_lea.sflag [#allocation4], %s1925_s6  ;;  %s2217_s30 = int_to_ptr.vmem [resolvable:$true] %s1041_s30 }
  0x5a   : > { %1191 = vmatprep.subr.bf16.mxu0 %v1392_v2  ;;  %1302 = vmatprep.subr.bf16.mxu1 %v1392_v2  ;;  %v1397_v7 = vld [vmem:[%s1937_s15 + $0x18] sm:$0xff]   ;;  %v1399_v9 = vld [vmem:[%s1937_s15 + $0x20] sm:$0xff]   ;;  %v1400_v10 = vld [vmem:[%s1937_s15 + $0x68] sm:$0xff]   ;;  %s1658_s16 = scalar_lea.vmem %s2217_s30, 4096  ;;  %p2281_p2 = scmp.ne.s32.totalorder %s2275_s22, 0 }
  0x5b   : > { %v225_v11 = vld [vmem:[%s1929_s29 + $0x8] sm:$0xff]  ;;  %v227_v12 = vld [vmem:[%s1929_s29 + $0x18] sm:$0xff]  ;;  %v224_v18 = vld [vmem:[%s1929_s29] sm:$0xff]  ;;  %p1659_p13 = scmp.ne.s32.totalorder %s2217_s30, %s1658_s16  ;;  %s1752_s18 = smov [#allocation7]  }
  0x5c   : > { %v257_v13 = vld [vmem:[%s1929_s29 + $0x108] sm:$0xff]  ;;  %v289_v15 = vmul.f32 0.2, %v225_v11  ;;  %v291_v16 = vmul.f32 0.2, %v227_v12  ;;  %v259_v17 = vld [vmem:[%s1929_s29 + $0x118] sm:$0xff] }
  0x5d   : > { %1192 = vmatpush3.bf16.msra.mxu0 %v1393_v3  ;;  %1310 = vmatpush3.bf16.msra.mxu1 %v1393_v3  ;;  %v1401_v14 = vld [vmem:[%s1937_s15 + $0x28] sm:$0xff]   ;;  %v1402_v19 = vld [vmem:[%s1937_s15 + $0x70] sm:$0xff]   ;;  %v321_v20 = vmul.f32 0.2, %v257_v13  ;;  %v323_v21 = vmul.f32 0.2, %v259_v17  ;;  %p1660_p11 = pnand %p1659_p13, %p2281_p2 }
  0x5e   : > { %1193 = vmatprep.subr.bf16.mxu0 %v1394_v4  ;;  %1303 = vmatprep.subr.bf16.mxu1 %v1394_v4  ;;  %v226_v22 = vld [vmem:[%s1929_s29 + $0x10] sm:$0xff]  ;;  %v256_v23 = vld [vmem:[%s1929_s29 + $0x100] sm:$0xff]  ;;  %v354_v24 = vmul.f32 1.442695, %v289_v15  ;;  %v358_v25 = vmul.f32 1.442695, %v291_v16 }
  0x5f   : > { %v288_v26 = vmul.f32 0.2, %v224_v18  ;;  %v418_v27 = vmul.f32 1.442695, %v321_v20  ;;  %v422_v28 = vmul.f32 1.442695, %v323_v21  ;;  %p1661_p12 = pneg %p1660_p11 }
  0x60   : > { %v290_v29 = vmul.f32 0.2, %v226_v22  ;;  %v1403_v30 = vld [vmem:[%s1937_s15 + $0x30] sm:$0xff]   ;;  %1406 = vpow2.f32 %v354_v24  ;;  %v320_v33 = vmul.f32 0.2, %v256_v23  ;;  %v229_v34 = vld [vmem:[%s1929_s29 + $0x28] sm:$0xff] }
  0x61   : > { %1194 = vmatpush3.bf16.msra.mxu0 %v1395_v5  ;;  %1311 = vmatpush3.bf16.msra.mxu1 %v1395_v5  ;;  %v352_v31 = vmul.f32 1.442695, %v288_v26  ;;  %v258_v32 = vld [vmem:[%s1929_s29 + $0x110] sm:$0xff]  ;;  %v1404_v35 = vld [vmem:[%s1937_s15 + $0x78] sm:$0xff]   ;;  %1408 = vpow2.f32 %v358_v25  ;;  %v261_v39 = vld [vmem:[%s1929_s29 + $0x128] sm:$0xff]  ;;  %s1662_s20 = sshll.u32 %s1752_s18, 4  ;;  %s1663_s20 = int_to_ptr.vmem [resolvable:$false] %s1662_s20 }
  0x62   : > { %1195 = vmatprep.subr.bf16.mxu0 %v1396_v6  ;;  %1304 = vmatprep.subr.bf16.mxu1 %v1396_v6  ;;  %v356_v36 = vmul.f32 1.442695, %v290_v29  ;;  %v322_v37 = vmul.f32 0.2, %v258_v32  ;;  %v231_v38 = vld [vmem:[%s1929_s29 + $0x38] sm:$0xff]  ;;  %1410 = vpow2.f32 %v418_v27  ;;  %v228_v46 = vld [vmem:[%s1929_s29 + $0x20] sm:$0xff]  ;;  %p1665_p6 = scmp.lt.s32.totalorder %s2217_s30, %s1663_s20 }
  0x63   : > { %v416_v40 = vmul.f32 1.442695, %v320_v33  ;;  %v293_v41 = vmul.f32 0.2, %v229_v34  ;;  %v295_v42 = vmul.f32 0.2, %v231_v38  ;;  %1412 = vpow2.f32 %v422_v28 }
  0x64   : > { %v420_v43 = vmul.f32 1.442695, %v322_v37  ;;  %v263_v44 = vld [vmem:[%s1929_s29 + $0x138] sm:$0xff]  ;;  %v325_v45 = vmul.f32 0.2, %v261_v39  ;;  %1414 = vpow2.f32 %v352_v31  ;;  %v230_v51 = vld [vmem:[%s1929_s29 + $0x30] sm:$0xff] }
  0x65   : > { %1196 = vmatpush3.bf16.msra.mxu0 %v1397_v7  ;;  %1312 = vmatpush3.bf16.msra.mxu1 %v1397_v7  ;;  %v1405_v47 = vld [vmem:[%s1937_s15 + $0x38] sm:$0xff]   ;;  %v362_v48 = vmul.f32 1.442695, %v293_v41  ;;  %v327_v49 = vmul.f32 0.2, %v263_v44  ;;  %1416 = vpow2.f32 %v356_v36  ;;  %v260_v53 = vld [vmem:[%s1929_s29 + $0x120] sm:$0xff] }
  0x66   : > { %1197 = vmatprep.subr.bf16.mxu0 %v1398_v8  ;;  %1305 = vmatprep.subr.bf16.mxu1 %v1398_v8  ;;  %v366_v50 = vmul.f32 1.442695, %v295_v42  ;;  %v292_v52 = vmul.f32 0.2, %v228_v46  ;;  %1418 = vpow2.f32 %v416_v40  ;;  %v426_v54 = vmul.f32 1.442695, %v325_v45 }
  0x67   : > { %v294_v55 = vmul.f32 0.2, %v230_v51  ;;  %v262_v56 = vld [vmem:[%s1929_s29 + $0x130] sm:$0xff]  ;;  %v233_v57 = vld [vmem:[%s1929_s29 + $0x48] sm:$0xff]  ;;  %1420 = vpow2.f32 %v420_v43  ;;  %v430_v58 = vmul.f32 1.442695, %v327_v49 }
  0x68   : > { %v324_v59 = vmul.f32 0.2, %v260_v53  ;;  %v326_v60 = vmul.f32 0.2, %v262_v56  ;;  %1422 = vpow2.f32 %v362_v48  ;;  %v360_v61 = vmul.f32 1.442695, %v292_v52 }
  0x69   : > { %1198 = vmatpush3.bf16.msra.mxu0 %v1399_v9  ;;  %1313 = vmatpush3.bf16.msra.mxu1 %v1399_v9  ;;  %v235_v62 = vld [vmem:[%s1929_s29 + $0x58] sm:$0xff]  ;;  %v297_v63 = vmul.f32 0.2, %v233_v57  ;;  %v265_v0 = vld [vmem:[%s1929_s29 + $0x148] sm:$0xff]  ;;  %1424 = vpow2.f32 %v366_v50  ;;  %v364_v1 = vmul.f32 1.442695, %v294_v55 }
  0x6a   : > { %1199 = vmatprep.subr.bf16.mxu0 %v1400_v10  ;;  %1306 = vmatprep.subr.bf16.mxu1 %v1400_v10  ;;  %v299_v2 = vmul.f32 0.2, %v235_v62  ;;  %v1978_v3 = vpop.eup %1406  ;;  %1426 = vpow2.f32 %v426_v54  ;;  %v424_v4 = vmul.f32 1.442695, %v324_v59  ;;  %v267_v5 = vld [vmem:[%s1929_s29 + $0x158] sm:$0xff]  ;;  %v232_v7 = vld [vmem:[%s1929_s29 + $0x40] sm:$0xff] }
  0x6b   : > { %v329_v6 = vmul.f32 0.2, %v265_v0  ;;  %v1982_v8 = vpop.eup %1408  ;;  %1428 = vpow2.f32 %v430_v58  ;;  %v428_v9 = vmul.f32 1.442695, %v326_v60  ;;  %v331_v10 = vmul.f32 0.2, %v267_v5 }
  0x6c   : > { %v234_v11 = vld [vmem:[%s1929_s29 + $0x50] sm:$0xff]  ;;  %v264_v12 = vld [vmem:[%s1929_s29 + $0x140] sm:$0xff]  ;;  %v1986_v13 = vpop.eup %1410  ;;  %1430 = vpow2.f32 %v360_v61  ;;  %v370_v15 = vmul.f32 1.442695, %v297_v63  ;;  %v296_v16 = vmul.f32 0.2, %v232_v7 }
  0x6d   : > { %1200 = vmatpush3.bf16.msra.mxu0 %v1401_v14  ;;  %1314 = vmatpush3.bf16.msra.mxu1 %v1401_v14  ;;  %v577_v14 = vpack.c.bf16 %v1982_v8, %v1978_v3  ;;  %v266_v17 = vld [vmem:[%s1929_s29 + $0x150] sm:$0xff]  ;;  %v237_v18 = vld [vmem:[%s1929_s29 + $0x68] sm:$0xff]  ;;  %1432 = vpow2.f32 %v364_v1  ;;  %v374_v20 = vmul.f32 1.442695, %v299_v2  ;;  %v298_v21 = vmul.f32 0.2, %v234_v11 }
  0x6e   : > { %1201 = vmatprep.subr.bf16.mxu0 %v1402_v19  ;;  %1307 = vmatprep.subr.bf16.mxu1 %v1402_v19  ;;  %v1992_v19 = vpop.eup %1412  ;;  %1434 = vpow2.f32 %v424_v4  ;;  %v434_v24 = vmul.f32 1.442695, %v329_v6  ;;  %v328_v25 = vmul.f32 0.2, %v264_v12  ;;  %v239_v26 = vld [vmem:[%s1929_s29 + $0x78] sm:$0xff]  ;;  %v269_v27 = vld [vmem:[%s1929_s29 + $0x168] sm:$0xff] }
  0x6f   : > { %v1415_v22 = vpop.eup %1414  ;;  %768 = vmatprep.mubr.bf16.mxu0 %v577_v14  ;;  %v593_v23 = vpack.c.bf16 %v1992_v19, %v1986_v13  ;;  %1436 = vpow2.f32 %v428_v9  ;;  %v438_v29 = vmul.f32 1.442695, %v331_v10  ;;  %v301_v31 = vmul.f32 0.2, %v237_v18  ;;  %v271_v36 = vld [vmem:[%s1929_s29 + $0x178] sm:$0xff]  ;;  %v236_v37 = vld [vmem:[%s1929_s29 + $0x60] sm:$0xff] }
  0x70   : > { %v1998_v28 = vpop.eup %1416  ;;  %1438 = vpow2.f32 %v370_v15  ;;  %v368_v34 = vmul.f32 1.442695, %v296_v16  ;;  %v372_v39 = vmul.f32 1.442695, %v298_v21  ;;  %v333_v40 = vmul.f32 0.2, %v269_v27 }
  0x71   : > { %1202 = vmatpush3.bf16.msra.mxu0 %v1403_v30  ;;  %1315 = vmatpush3.bf16.msra.mxu1 %v1403_v30  ;;  %v330_v30 = vmul.f32 0.2, %v266_v17  ;;  %v2000_v32 = vpop.eup %1418  ;;  %v576_v33 = vpack.c.bf16 %v1998_v28, %v1415_v22  ;;  %1440 = vpow2.f32 %v374_v20  ;;  %v432_v43 = vmul.f32 1.442695, %v328_v25  ;;  %v238_v45 = vld [vmem:[%s1929_s29 + $0x70] sm:$0xff]  ;;  %v268_v46 = vld [vmem:[%s1929_s29 + $0x160] sm:$0xff] }
  0x72   : > { %1203 = vmatprep.subr.bf16.mxu0 %v1404_v35  ;;  %1308 = vmatprep.subr.bf16.mxu1 %v1404_v35  ;;  %v303_v35 = vmul.f32 0.2, %v239_v26  ;;  %v2005_v38 = vpop.eup %1420  ;;  %1442 = vpow2.f32 %v434_v24  ;;  %v335_v44 = vmul.f32 0.2, %v271_v36  ;;  %v378_v49 = vmul.f32 1.442695, %v301_v31 }
  0x73   : > { %832 = vmatprep.mubr.bf16.mxu1 %v593_v23  ;;  %v1423_v41 = vpop.eup %1422  ;;  %v592_v42 = vpack.c.bf16 %v2005_v38, %v2000_v32  ;;  %1444 = vpow2.f32 %v438_v29  ;;  %v436_v48 = vmul.f32 1.442695, %v330_v30  ;;  %v300_v50 = vmul.f32 0.2, %v236_v37  ;;  %v270_v55 = vld [vmem:[%s1929_s29 + $0x170] sm:$0xff]  ;;  %v241_v56 = vld [vmem:[%s1929_s29 + $0x88] sm:$0xff] }
  0x74   : > { %1446 = vpow2.f32 %v368_v34  ;;  %v382_v53 = vmul.f32 1.442695, %v303_v35  ;;  %v442_v54 = vmul.f32 1.442695, %v333_v40  ;;  %v302_v58 = vmul.f32 0.2, %v238_v45 }
  0x75   : > { %1204 = vmatpush3.bf16.msra.mxu0 %v1405_v47  ;;  %1316 = vmatpush3.bf16.msra.mxu1 %v1405_v47  ;;  %v2011_v47 = vpop.eup %1424  ;;  %1448 = vpow2.f32 %v372_v39  ;;  %v332_v59 = vmul.f32 0.2, %v268_v46  ;;  %v480_v60 = vadd.f32 %v1415_v22, %v1978_v3  ;;  %v243_v61 = vld [vmem:[%s1929_s29 + $0x98] sm:$0xff]  ;;  %v273_v62 = vld [vmem:[%s1929_s29 + $0x188] sm:$0xff]  ;;  %v446_v1 = vmul.f32 1.442695, %v335_v44 }
  0x76   : > { %v2013_v51 = vpop.eup %1426  ;;  %v579_v52 = vpack.c.bf16 %v2011_v47, %v1423_v41  ;;  %1450 = vpow2.f32 %v432_v43  ;;  %v334_v2 = vmul.f32 0.2, %v270_v55  ;;  %v376_v5 = vmul.f32 1.442695, %v300_v50  ;;  %v275_v9 = vld [vmem:[%s1929_s29 + $0x198] sm:$0xff]  ;;  %v240_v14 = vld [vmem:[%s1929_s29 + $0x80] sm:$0xff] }
  0x77   : > { %v2018_v57 = vpop.eup %1428  ;;  %1452 = vpow2.f32 %v436_v48  ;;  %481 = vadd.xlane.f32.xlu0 %v480_v60  ;;  %v305_v7 = vmul.f32 0.2, %v241_v56  ;;  %v307_v11 = vmul.f32 0.2, %v243_v61  ;;  %v337_v12 = vmul.f32 0.2, %v273_v62 }
  0x78   : > { %769 = vmatmul.mubr.bf16.vlgmr.msra.gmra.mrb[0].mxu0 %v576_v33  ;;  %833 = vmatmul.mubr.bf16.vlgmr.msra.gmra.mrb[0].mxu1 %v592_v42  ;;  %v1431_v63 = vpop.eup %1430  ;;  %v595_v0 = vpack.c.bf16 %v2018_v57, %v2013_v51  ;;  %1454 = vpow2.f32 %v378_v49  ;;  %v380_v16 = vmul.f32 1.442695, %v302_v58  ;;  %v440_v17 = vmul.f32 1.442695, %v332_v59  ;;  %v242_v23 = vld [vmem:[%s1929_s29 + $0x90] sm:$0xff]  ;;  %v272_v27 = vld [vmem:[%s1929_s29 + $0x180] sm:$0xff] }
  0x79   : > { %776 = vmatprep.mubr.bf16.mxu0 %v579_v52  ;;  %v1433_v4 = vpop.eup %1432  ;;  %v486_v6 = vadd.f32 %v1431_v63, %v1423_v41  ;;  %1456 = vpow2.f32 %v382_v53  ;;  %v444_v21 = vmul.f32 1.442695, %v334_v2  ;;  %v339_v22 = vmul.f32 0.2, %v275_v9  ;;  %v274_v34 = vld [vmem:[%s1929_s29 + $0x190] sm:$0xff]  ;;  %v245_v40 = vld [vmem:[%s1929_s29 + $0xa8] sm:$0xff] }
  0x7a   : > { %v2026_v10 = vpop.eup %1434  ;;  %840 = vmatprep.mubr.bf16.mxu1 %v595_v0  ;;  %v578_v3 = vpack.c.bf16 %v1433_v4, %v1431_v63  ;;  %1458 = vpow2.f32 %v442_v54  ;;  %v386_v25 = vmul.f32 1.442695, %v305_v7  ;;  %v304_v26 = vmul.f32 0.2, %v240_v14  ;;  %v247_v45 = vld [vmem:[%s1929_s29 + $0xb8] sm:$0xff]  ;;  %v277_v46 = vld [vmem:[%s1929_s29 + $0x1a8] sm:$0xff] }
  0x7b   : > { %v2029_v15 = vpop.eup %1436  ;;  %487 = vadd.xlane.f32.xlu1 %v486_v6  ;;  %1460 = vpow2.f32 %v446_v1  ;;  %v390_v31 = vmul.f32 1.442695, %v307_v11  ;;  %v450_v33 = vmul.f32 1.442695, %v337_v12  ;;  %v306_v36 = vmul.f32 0.2, %v242_v23 }
  0x7c   : > { %v1439_v18 = vpop.eup %1438  ;;  %v594_v20 = vpack.c.bf16 %v2029_v15, %v2026_v10  ;;  %1462 = vpow2.f32 %v376_v5  ;;  %v483_v37 = vadd.f32 %v1998_v28, %v1982_v8  ;;  %v489_v39 = vadd.f32 %v1433_v4, %v2011_v47  ;;  %v279_v28 = vld [vmem:[%s1929_s29 + $0x1b8] sm:$0xff]  ;;  %v244_v55 = vld [vmem:[%s1929_s29 + $0xa0] sm:$0xff]  ;;  %v246_v1 = vld [vmem:[%s1929_s29 + $0xb0] sm:$0xff]  ;;  %s1664_s4 = scalar_lea.vmem %s1663_s20, 8192 }
  0x7d   : > { %v1441_v24 = vpop.eup %1440  ;;  %1464 = vpow2.f32 %v380_v16  ;;  %v454_v43 = vmul.f32 1.442695, %v339_v22  ;;  %v336_v44 = vmul.f32 0.2, %v272_v27  ;;  %v384_v49 = vmul.f32 1.442695, %v304_v26  ;;  %p1666_p7 = scmp.lt.s32.totalorder %s1664_s4, %s1658_s16 }
  0x7e   : > { %v2035_v29 = vpop.eup %1442  ;;  %v581_v30 = vpack.c.bf16 %v1441_v24, %v1439_v18  ;;  %1466 = vpow2.f32 %v440_v17  ;;  %v338_v50 = vmul.f32 0.2, %v274_v34  ;;  %484 = vadd.xlane.f32.xlu0 %v483_v37  ;;  %v309_v54 = vmul.f32 0.2, %v245_v40  ;;  %v276_v6 = vld [vmem:[%s1929_s29 + $0x1a0] sm:$0xff]  ;;  %v278_v11 = vld [vmem:[%s1929_s29 + $0x1b0] sm:$0xff] }
  0x7f   : > { %v2038_v35 = vpop.eup %1444  ;;  %1468 = vpow2.f32 %v444_v21  ;;  %490 = vadd.xlane.f32.xlu1 %v489_v39  ;;  %v388_v58 = vmul.f32 1.442695, %v306_v36  ;;  %v311_v59 = vmul.f32 0.2, %v247_v45  ;;  %v341_v60 = vmul.f32 0.2, %v277_v46  ;;  %p1667_p0 = por %p1666_p7, %p1665_p6 }
  0x80   : > { %777 = vmatmul.mubr.bf16.gmra.mrb[4].mxu0 %v578_v3  ;;  %841 = vmatmul.mubr.bf16.gmra.mrb[4].mxu1 %v594_v20  ;;  %v1447_v41 = vpop.eup %1446  ;;  %v597_v42 = vpack.c.bf16 %v2038_v35, %v2035_v29  ;;  %1470 = vpow2.f32 %v386_v25  ;;  %v448_v63 = vmul.f32 1.442695, %v336_v44  ;;  %v343_v0 = vmul.f32 0.2, %v279_v28  ;;  %v249_v12 = vld [vmem:[%s1929_s29 + $0xc8] sm:$0xff]  ;;  %v283_v39 = vld [vmem:[%s1929_s29 + $0x1d8] sm:$0xff] }
  0x81   : > { %784 = vmatprep.mubr.bf16.mxu0 %v581_v30  ;;  %v1449_v48 = vpop.eup %1448  ;;  %v492_v8 = vadd.f32 %v1447_v41, %v1439_v18  ;;  %1472 = vpow2.f32 %v390_v31  ;;  %v452_v4 = vmul.f32 1.442695, %v338_v50  ;;  %v308_v5 = vmul.f32 0.2, %v244_v55  ;;  %v281_v31 = vld [vmem:[%s1929_s29 + $0x1c8] sm:$0xff]  ;;  %v248_v40 = vld [vmem:[%s1929_s29 + $0xc0] sm:$0xff]  ;;  %p1668_p9 = pnand %p1667_p0, %p1661_p12 }
  0x82   : > { %v2049_v47 = vpop.eup %1450  ;;  %848 = vmatprep.mubr.bf16.mxu1 %v597_v42  ;;  %v580_v52 = vpack.c.bf16 %v1449_v48, %v1447_v41  ;;  %v495_v53 = vadd.f32 %v1449_v48, %v1441_v24  ;;  %1474 = vpow2.f32 %v450_v33  ;;  %v394_v3 = vmul.f32 1.442695, %v309_v54  ;;  %v251_v24 = vld [vmem:[%s1929_s29 + $0xd8] sm:$0xff]  ;;  %v250_v44 = vld [vmem:[%s1929_s29 + $0xd0] sm:$0xff]  ;;  %v280_v50 = vld [vmem:[%s1929_s29 + $0x1c0] sm:$0xff] }
  0x83   : > { %v2052_v56 = vpop.eup %1452  ;;  %1476 = vpow2.f32 %v454_v43  ;;  %493 = vadd.xlane.f32.xlu0 %v492_v8  ;;  %v398_v16 = vmul.f32 1.442695, %v311_v59  ;;  %v458_v17 = vmul.f32 1.442695, %v341_v60  ;;  %v310_v18 = vmul.f32 0.2, %v246_v1 }
  0x84   : > { %v1455_v61 = vpop.eup %1454  ;;  %v596_v62 = vpack.c.bf16 %v2052_v56, %v2049_v47  ;;  %496 = vadd.xlane.f32.xlu1 %v495_v53  ;;  %1478 = vpow2.f32 %v384_v49  ;;  %v462_v22 = vmul.f32 1.442695, %v343_v0  ;;  %v340_v23 = vmul.f32 0.2, %v276_v6  ;;  %v282_v8 = vld [vmem:[%s1929_s29 + $0x1d0] sm:$0xff]  ;;  %v253_v60 = vld [vmem:[%s1929_s29 + $0xe8] sm:$0xff] }
  0x85   : > { %v1457_v2 = vpop.eup %1456  ;;  %1480 = vpow2.f32 %v388_v58  ;;  %v392_v26 = vmul.f32 1.442695, %v308_v5  ;;  %v342_v27 = vmul.f32 0.2, %v278_v11  ;;  %v313_v37 = vmul.f32 0.2, %v249_v12 }
  0x86   : > { %v2058_v7 = vpop.eup %1458  ;;  %v583_v9 = vpack.c.bf16 %v1457_v2, %v1455_v61  ;;  %1482 = vpow2.f32 %v448_v63  ;;  %v396_v42 = vmul.f32 1.442695, %v310_v18  ;;  %v315_v43 = vmul.f32 0.2, %v251_v24  ;;  %v255_v6 = vld [vmem:[%s1929_s29 + $0xf8] sm:$0xff] }
  0x87   : > { %v2062_v14 = vpop.eup %1460  ;;  %1484 = vpow2.f32 %v452_v4  ;;  %v456_v48 = vmul.f32 1.442695, %v340_v23  ;;  %v345_v49 = vmul.f32 0.2, %v281_v31  ;;  %v347_v53 = vmul.f32 0.2, %v283_v39 }
  0x88   : > { %785 = vmatmul.mubr.bf16.gmra.mrb[8].mxu0 %v580_v52  ;;  %849 = vmatmul.mubr.bf16.gmra.mrb[8].mxu1 %v596_v62  ;;  %v1463_v20 = vpop.eup %1462  ;;  %v599_v21 = vpack.c.bf16 %v2062_v14, %v2058_v7  ;;  %1486 = vpow2.f32 %v394_v3  ;;  %v460_v52 = vmul.f32 1.442695, %v342_v27  ;;  %v312_v54 = vmul.f32 0.2, %v248_v40  ;;  %v252_v23 = vld [vmem:[%s1929_s29 + $0xe0] sm:$0xff] }
  0x89   : > { %792 = vmatprep.mubr.bf16.mxu0 %v583_v9  ;;  %v1465_v25 = vpop.eup %1464  ;;  %v498_v30 = vadd.f32 %v1463_v20, %v1455_v61  ;;  %1488 = vpow2.f32 %v398_v16  ;;  %v402_v59 = vmul.f32 1.442695, %v313_v37  ;;  %v406_v62 = vmul.f32 1.442695, %v315_v43  ;;  %v285_v16 = vld [vmem:[%s1929_s29 + $0x1e8] sm:$0xff]  ;;  %v254_v37 = vld [vmem:[%s1929_s29 + $0xf0] sm:$0xff] }
  0x8a   : > { %v2068_v33 = vpop.eup %1466  ;;  %856 = vmatprep.mubr.bf16.mxu1 %v599_v21  ;;  %v582_v34 = vpack.c.bf16 %v1465_v25, %v1463_v20  ;;  %v501_v36 = vadd.f32 %v1465_v25, %v1457_v2  ;;  %1490 = vpow2.f32 %v458_v17  ;;  %v314_v63 = vmul.f32 0.2, %v250_v44 }
  0x8b   : > { %v2072_v41 = vpop.eup %1468  ;;  %499 = vadd.xlane.f32.xlu0 %v498_v30  ;;  %1492 = vpow2.f32 %v462_v22  ;;  %v344_v0 = vmul.f32 0.2, %v280_v50  ;;  %v466_v4 = vmul.f32 1.442695, %v345_v49  ;;  %v346_v5 = vmul.f32 0.2, %v282_v8 }
  0x8c   : > { %v1471_v45 = vpop.eup %1470  ;;  %v598_v46 = vpack.c.bf16 %v2072_v41, %v2068_v33  ;;  %502 = vadd.xlane.f32.xlu1 %v501_v36  ;;  %1494 = vpow2.f32 %v392_v26  ;;  %v470_v11 = vmul.f32 1.442695, %v347_v53  ;;  %v400_v12 = vmul.f32 1.442695, %v312_v54  ;;  %v287_v22 = vld [vmem:[%s1929_s29 + $0x1f8] sm:$0xff]  ;;  %v286_v50 = vld [vmem:[%s1929_s29 + $0x1f0] sm:$0xff] }
  0x8d   : > { %v1473_v28 = vpop.eup %1472  ;;  %1496 = vpow2.f32 %v396_v42  ;;  %v317_v21 = vmul.f32 0.2, %v253_v60  ;;  %v404_v25 = vmul.f32 1.442695, %v314_v63  ;;  %v464_v26 = vmul.f32 1.442695, %v344_v0 }
  0x8e   : > { %v2079_v55 = vpop.eup %1474  ;;  %v585_v58 = vpack.c.bf16 %v1473_v28, %v1471_v45  ;;  %1498 = vpow2.f32 %v456_v48  ;;  %v319_v27 = vmul.f32 0.2, %v255_v6  ;;  %v349_v36 = vmul.f32 0.2, %v285_v16  ;;  %v284_v42 = vld [vmem:[%s1929_s29 + $0x1e0] sm:$0xff] }
  0x8f   : > { %v2082_v61 = vpop.eup %1476  ;;  %1500 = vpow2.f32 %v460_v52  ;;  %v351_v40 = vmul.f32 0.2, %v287_v22  ;;  %v2100_v43 = vadd.f32 %v2000_v32, %v1986_v13  ;;  %v2104_v44 = vadd.f32 %v2005_v38, %v1992_v19 }
  0x90   : > { %793 = vmatmul.mubr.bf16.gmra.mrb[12].mxu0 %v582_v34  ;;  %857 = vmatmul.mubr.bf16.gmra.mrb[12].mxu1 %v598_v46  ;;  %v1479_v1 = vpop.eup %1478  ;;  %v601_v2 = vpack.c.bf16 %v2082_v61, %v2079_v55  ;;  %1502 = vpow2.f32 %v402_v59  ;;  %v468_v34 = vmul.f32 1.442695, %v346_v5  ;;  %v410_v48 = vmul.f32 1.442695, %v317_v21 }
  0x91   : > { %800 = vmatprep.mubr.bf16.mxu0 %v585_v58  ;;  %v1481_v9 = vpop.eup %1480  ;;  %v504_v3 = vadd.f32 %v1479_v1, %v1471_v45  ;;  %1504 = vpow2.f32 %v406_v62  ;;  %v316_v49 = vmul.f32 0.2, %v252_v23  ;;  %v318_v52 = vmul.f32 0.2, %v254_v37 }
  0x92   : > { %v2088_v17 = vpop.eup %1482  ;;  %864 = vmatprep.mubr.bf16.mxu1 %v601_v2  ;;  %v584_v18 = vpack.c.bf16 %v1481_v9, %v1479_v1  ;;  %v507_v20 = vadd.f32 %v1481_v9, %v1473_v28  ;;  %1506 = vpow2.f32 %v466_v4  ;;  %v414_v28 = vmul.f32 1.442695, %v319_v27 }
  0x93   : > { %v2092_v24 = vpop.eup %1484  ;;  %505 = vadd.xlane.f32.xlu0 %v504_v3  ;;  %1508 = vpow2.f32 %v470_v11  ;;  %v2113_v13 = vadd.f32 %v2029_v15, %v2018_v57  ;;  %v474_v38 = vmul.f32 1.442695, %v349_v36  ;;  %v348_v53 = vmul.f32 0.2, %v284_v42 }
  0x94   : > { %v1487_v30 = vpop.eup %1486  ;;  %v600_v31 = vpack.c.bf16 %v2092_v24, %v2088_v17  ;;  %508 = vadd.xlane.f32.xlu1 %v507_v20  ;;  %1510 = vpow2.f32 %v400_v12  ;;  %v478_v59 = vmul.f32 1.442695, %v351_v40  ;;  %v350_v60 = vmul.f32 0.2, %v286_v50 }
  0x95   : > { %v1489_v39 = vpop.eup %1488  ;;  %1512 = vpow2.f32 %v404_v25  ;;  %v408_v57 = vmul.f32 1.442695, %v316_v49  ;;  %v412_v1 = vmul.f32 1.442695, %v318_v52  ;;  %v472_v5 = vmul.f32 1.442695, %v348_v53 }
  0x96   : > { %v2106_v45 = vpop.eup %1490  ;;  %v587_v46 = vpack.c.bf16 %v1489_v39, %v1487_v30  ;;  %1514 = vpow2.f32 %v464_v26  ;;  %v476_v9 = vmul.f32 1.442695, %v350_v60  ;;  %v546_v53 = vadd.f32 %v2068_v33, %v2058_v7 }
  0x97   : > { %v2109_v8 = vpop.eup %1492  ;;  %1516 = vpow2.f32 %v468_v34 }
  0x98   : > { %801 = vmatmul.mubr.bf16.gmra.mrb[16].mxu0 %v584_v18  ;;  %865 = vmatmul.mubr.bf16.gmra.mrb[16].mxu1 %v600_v31  ;;  %v1495_v32 = vpop.eup %1494  ;;  %v603_v19 = vpack.c.bf16 %v2109_v8, %v2106_v45  ;;  %1518 = vpow2.f32 %v410_v48 }
  0x99   : > { %808 = vmatprep.mubr.bf16.mxu0 %v587_v46  ;;  %v1497_v54 = vpop.eup %1496  ;;  %v510_v58 = vadd.f32 %v1495_v32, %v1487_v30  ;;  %1520 = vpow2.f32 %v414_v28 }
  0x9a   : > { %v2117_v62 = vpop.eup %1498  ;;  %872 = vmatprep.mubr.bf16.mxu1 %v603_v19  ;;  %v586_v63 = vpack.c.bf16 %v1497_v54, %v1495_v32  ;;  %v513_v0 = vadd.f32 %v1497_v54, %v1489_v39  ;;  %1522 = vpow2.f32 %v474_v38  ;;  %v534_v32 = vadd.f32 %v2026_v10, %v2013_v51 }
  0x9b   : > { %v2119_v15 = vpop.eup %1500  ;;  %511 = vadd.xlane.f32.xlu0 %v510_v58  ;;  %1524 = vpow2.f32 %v478_v59  ;;  %v540_v19 = vadd.f32 %v2049_v47, %v2035_v29  ;;  %v543_v38 = vadd.f32 %v2052_v56, %v2038_v35  ;;  %v552_v51 = vadd.f32 %v2088_v17, %v2079_v55 }
  0x9c   : > { %v1503_v2 = vpop.eup %1502  ;;  %v602_v4 = vpack.c.bf16 %v2119_v15, %v2117_v62  ;;  %514 = vadd.xlane.f32.xlu1 %v513_v0  ;;  %1526 = vpow2.f32 %v408_v57  ;;  %v555_v10 = vadd.f32 %v2092_v24, %v2082_v61  ;;  %v558_v29 = vadd.f32 %v2117_v62, %v2106_v45 }
  0x9d   : > { %v1505_v6 = vpop.eup %1504  ;;  %1528 = vpow2.f32 %v412_v1  ;;  %v561_v35 = vadd.f32 %v2119_v15, %v2109_v8 }
  0x9e   : > { %v2123_v3 = vpop.eup %1506  ;;  %v589_v11 = vpack.c.bf16 %v1505_v6, %v1503_v2  ;;  %1530 = vpow2.f32 %v472_v5 }
  0x9f   : > { %v1509_v12 = vpop.eup %1508  ;;  %1532 = vpow2.f32 %v476_v9 }
  0xa0   : > { %809 = vmatmul.mubr.bf16.gmra.mrb[20].mxu0 %v586_v63  ;;  %873 = vmatmul.mubr.bf16.gmra.mrb[20].mxu1 %v602_v4  ;;  %v1511_v16 = vpop.eup %1510  ;;  %v605_v18 = vpack.c.bf16 %v1509_v12, %v2123_v3 }
  0xa1   : > { %816 = vmatprep.mubr.bf16.mxu0 %v589_v11  ;;  %v1513_v20 = vpop.eup %1512  ;;  %v516_v21 = vadd.f32 %v1511_v16, %v1503_v2 }
  0xa2   : > { %v1515_v22 = vpop.eup %1514  ;;  %880 = vmatprep.mubr.bf16.mxu1 %v605_v18  ;;  %v588_v23 = vpack.c.bf16 %v1513_v20, %v1511_v16  ;;  %v519_v25 = vadd.f32 %v1513_v20, %v1505_v6 }
  0xa3   : > { %v1517_v26 = vpop.eup %1516  ;;  %517 = vadd.xlane.f32.xlu0 %v516_v21  ;;  %v564_v47 = vadd.f32 %v1515_v22, %v2123_v3 }
  0xa4   : > { %v1519_v27 = vpop.eup %1518  ;;  %v604_v30 = vpack.c.bf16 %v1517_v26, %v1515_v22  ;;  %520 = vadd.xlane.f32.xlu1 %v519_v25  ;;  %v567_v56 = vadd.f32 %v1517_v26, %v1509_v12 }
  0xa5   : > { %v1521_v31 = vpop.eup %1520 }
  0xa6   : > { %v1523_v34 = vpop.eup %1522  ;;  %v591_v36 = vpack.c.bf16 %v1521_v31, %v1519_v27 }
  0xa7   : > { %v1525_v37 = vpop.eup %1524 }
  0xa8   : > { %817 = vmatmul.mubr.bf16.gmra.mrb[24].mxu0 %v588_v23  ;;  %881 = vmatmul.mubr.bf16.gmra.mrb[24].mxu1 %v604_v30  ;;  %v1527_v39 = vpop.eup %1526  ;;  %v607_v40 = vpack.c.bf16 %v1525_v37, %v1523_v34 }
  0xa9   : > { %824 = vmatprep.mubr.bf16.mxu0 %v591_v36  ;;  %v1529_v42 = vpop.eup %1528  ;;  %v522_v46 = vadd.f32 %v1527_v39, %v1519_v27 }
  0xaa   : > { %v1531_v48 = vpop.eup %1530  ;;  %888 = vmatprep.mubr.bf16.mxu1 %v607_v40  ;;  %v590_v49 = vpack.c.bf16 %v1529_v42, %v1527_v39  ;;  %v525_v50 = vadd.f32 %v1529_v42, %v1521_v31 }
  0xab   : > { %v1533_v28 = vpop.eup %1532  ;;  %523 = vadd.xlane.f32.xlu0 %v522_v46  ;;  %v570_v7 = vadd.f32 %v1531_v48, %v1523_v34 }
  0xac   : > { %v606_v52 = vpack.c.bf16 %v1533_v28, %v1531_v48  ;;  %526 = vadd.xlane.f32.xlu1 %v525_v50 }
  0xaf   : > { %529 = vadd.xlane.f32.xlu0 %v2100_v43  ;;  %v549_v43 = vadd.f32 %v2072_v41, %v2062_v14  ;;  %v573_v14 = vadd.f32 %v1533_v28, %v1525_v37 }
  0xb0   : > { %825 = vmatmul.mubr.bf16.gmra.mrb[28].mxu0 %v590_v49  ;;  %889 = vmatmul.mubr.bf16.gmra.mrb[28].mxu1 %v606_v52 }
  0xb1   : > { %532 = vadd.xlane.f32.xlu1 %v2104_v44 }
  0xb3   : > { %535 = vadd.xlane.f32.xlu0 %v534_v32 }
  0xb5   : > { %538 = vadd.xlane.f32.xlu1 %v2113_v13 }
  0xb7   : > { %541 = vadd.xlane.f32.xlu0 %v540_v19 }
  0xb9   : > { %544 = vadd.xlane.f32.xlu1 %v543_v38 }
  0xbb   : > { %547 = vadd.xlane.f32.xlu0 %v546_v53 }
  0xbd   : > { %550 = vadd.xlane.f32.xlu1 %v549_v43 }
  0xbf   : > { %553 = vadd.xlane.f32.xlu0 %v552_v51 }
  0xc1   : > { %556 = vadd.xlane.f32.xlu1 %v555_v10 }
  0xc3   : > { %559 = vadd.xlane.f32.xlu0 %v558_v29 }
  0xc5   : > { %562 = vadd.xlane.f32.xlu1 %v561_v35 }
  0xc7   : > { %565 = vadd.xlane.f32.xlu0 %v564_v47 }
  0xc9   : > { %568 = vadd.xlane.f32.xlu1 %v567_v56 }
  0xcb   : > { %571 = vadd.xlane.f32.xlu0 %v570_v7 }
  0xcd   : > { %574 = vadd.xlane.f32.xlu1 %v573_v14 }
 0x104   : > { %v482_v33 = vpop.xlane.xlu0 %481 }
 0x105   : > { %1534 = vrcp.f32 %v482_v33 }
 0x108   : > { %v488_v41 = vpop.xlane.xlu1 %487 }
 0x10b   : > { %v485_v55 = vpop.xlane.xlu0 %484 }
 0x10c   : > { %v491_v61 = vpop.xlane.xlu1 %490  ;;  %1536 = vrcp.f32 %v485_v55 }
 0x10f   : > { %v1535_v2 = vpop.eup %1534 }
 0x110   : > { %v494_v17 = vpop.xlane.xlu0 %493  ;;  %v898_v12 = vmul.f32 0.25, %v1535_v2 }
 0x111   : > { %v497_v24 = vpop.xlane.xlu1 %496 }
 0x116   : > { %v1537_v4 = vpop.eup %1536 }
 0x117   : > { %v900_v16 = vmul.f32 0.25, %v1537_v4 }
 0x118   : > { %v2148_v44 = vpop.xlane.xlu0 %499 }
 0x119   : > { %v2150_v45 = vpop.xlane.xlu1 %502 }
 0x120   : > { %v2152_v8 = vpop.xlane.xlu0 %505 }
 0x121   : > { %v2154_v13 = vpop.xlane.xlu1 %508 }
 0x128   : > { %v2156_v54 = vpop.xlane.xlu0 %511 }
 0x129   : > { %v2158_v58 = vpop.xlane.xlu1 %514 }
 0x130   : > { %v2160_v59 = vpop.xlane.xlu0 %517 }
 0x131   : > { %v2162_v60 = vpop.xlane.xlu1 %520 }
 0x138   : > { %v2164_v62 = vpop.xlane.xlu0 %523 }
 0x139   : > { %v2166_v63 = vpop.xlane.xlu1 %526 }
 0x13c   : > { %v530_v0 = vpop.xlane.xlu0 %529 }
 0x13d   : > { %1538 = vrcp.f32 %v530_v0 }
 0x13e   : > { %v533_v57 = vpop.xlane.xlu1 %532 }
 0x13f   : > { %1540 = vrcp.f32 %v533_v57 }
 0x140   : > { %v536_v15 = vpop.xlane.xlu0 %535  ;;  %1542 = vrcp.f32 %v488_v41 }
 0x141   : > { %1544 = vrcp.f32 %v536_v15 }
 0x142   : > { %v539_v1 = vpop.xlane.xlu1 %538  ;;  %1546 = vrcp.f32 %v491_v61 }
 0x143   : > { %1548 = vrcp.f32 %v539_v1 }
 0x144   : > { %v542_v11 = vpop.xlane.xlu0 %541  ;;  %1550 = vrcp.f32 %v494_v17 }
 0x145   : > { %1552 = vrcp.f32 %v542_v11 }
 0x146   : > { %v545_v36 = vpop.xlane.xlu1 %544  ;;  %1554 = vrcp.f32 %v497_v24 }
 0x147   : > { %v1539_v5 = vpop.eup %1538  ;;  %1556 = vrcp.f32 %v545_v36 }
 0x148   : > { %v930_v18 = vmul.f32 0.25, %v1539_v5  ;;  %v548_v19 = vpop.xlane.xlu0 %547  ;;  %1558 = vrcp.f32 %v2148_v44 }
 0x149   : > { %v1541_v9 = vpop.eup %1540  ;;  %1560 = vrcp.f32 %v548_v19 }
 0x14a   : > { %v932_v26 = vmul.f32 0.25, %v1541_v9  ;;  %v1543_v39 = vpop.eup %1542  ;;  %v551_v55 = vpop.xlane.xlu1 %550  ;;  %1562 = vrcp.f32 %v2150_v45 }
 0x14b   : > { %v1205_v6 = vpop.f32.mrb[0].mxu0  ;;  %v1253_v20 = vpop.f32.mrb[0].mxu1  ;;  %v902_v38 = vmul.f32 0.25, %v1543_v39  ;;  %1564 = vrcp.f32 %v551_v55 }
 0x14c   : > { %v1206_v3 = vpop.f32.mrb[1].mxu0  ;;  %v1254_v23 = vpop.f32.mrb[1].mxu1  ;;  %1566 = vrcp.f32 %v2152_v8 }
 0x14d   : > { %v1207_v21 = vadd.f32 %v1206_v3, %v1205_v6  ;;  %v1208_v22 = vpop.f32.mrb[2].mxu0  ;;  %v1255_v30 = vadd.f32 %v1254_v23, %v1253_v20  ;;  %v1256_v31 = vpop.f32.mrb[2].mxu1 }
 0x14e   : > { %v1209_v25 = vpop.f32.mrb[3].mxu0  ;;  %v1257_v37 = vpop.f32.mrb[3].mxu1 }
 0x14f   : > { %v961_v27 = vmul.f32 %v1207_v21, %v898_v12  ;;  %v1210_v34 = vadd.f32 %v1209_v25, %v1208_v22  ;;  %v977_v40 = vmul.f32 %v1255_v30, %v930_v18  ;;  %v1258_v46 = vadd.f32 %v1257_v37, %v1256_v31  ;;  %v1545_v48 = vpop.eup %1544  ;;  %v554_v6 = vpop.xlane.xlu0 %553 }
 0x150   : > { %v1547_v49 = vpop.eup %1546  ;;  %v934_v53 = vmul.f32 0.25, %v1545_v48  ;;  %1568 = vrcp.f32 %v554_v6 }
 0x151   : > { %993 = vst [vmem:[%s2169_s19] sm:$0xff] %v961_v27  ;;  %v962_v42 = vmul.f32 %v1210_v34, %v900_v16  ;;  %1009 = vst [vmem:[%s2169_s19 + $0x80] sm:$0xff] %v977_v40  ;;  %v978_v50 = vmul.f32 %v1258_v46, %v932_v26  ;;  %v1549_v52 = vpop.eup %1548  ;;  %v904_v29 = vmul.f32 0.25, %v1547_v49  ;;  %v557_v27 = vpop.xlane.xlu1 %556  ;;  %1570 = vrcp.f32 %v2154_v13 }
 0x152   : > { %v936_v56 = vmul.f32 0.25, %v1549_v52  ;;  %v1551_v61 = vpop.eup %1550  ;;  %1572 = vrcp.f32 %v557_v27 }
 0x153   : > { %994 = vst [vmem:[%s2169_s19 + $0x8] sm:$0xff] %v962_v42  ;;  %v1211_v28 = vpop.f32.mrb[4].mxu0  ;;  %1010 = vst [vmem:[%s2169_s19 + $0x88] sm:$0xff] %v978_v50  ;;  %v1259_v43 = vpop.f32.mrb[4].mxu1  ;;  %v906_v9 = vmul.f32 0.25, %v1551_v61  ;;  %1574 = vrcp.f32 %v2156_v54 }
 0x154   : > { %v1212_v32 = vpop.f32.mrb[5].mxu0  ;;  %v1260_v35 = vpop.f32.mrb[5].mxu1 }
 0x155   : > { %v1213_v51 = vadd.f32 %v1212_v32, %v1211_v28  ;;  %v1214_v10 = vpop.f32.mrb[6].mxu0  ;;  %v1261_v14 = vadd.f32 %v1260_v35, %v1259_v43  ;;  %v1262_v33 = vpop.f32.mrb[6].mxu1 }
 0x156   : > { %v1215_v47 = vpop.f32.mrb[7].mxu0  ;;  %v1263_v17 = vpop.f32.mrb[7].mxu1 }
 0x157   : > { %v963_v7 = vmul.f32 %v1213_v51, %v902_v38  ;;  %v1216_v41 = vadd.f32 %v1215_v47, %v1214_v10  ;;  %v979_v24 = vmul.f32 %v1261_v14, %v934_v53  ;;  %v1264_v44 = vadd.f32 %v1263_v17, %v1262_v33  ;;  %v1553_v57 = vpop.eup %1552  ;;  %v560_v49 = vpop.xlane.xlu0 %559 }
 0x158   : > { %v1555_v15 = vpop.eup %1554  ;;  %v938_v3 = vmul.f32 0.25, %v1553_v57  ;;  %v563_v47 = vpop.xlane.xlu1 %562  ;;  %1576 = vrcp.f32 %v560_v49 }
 0x159   : > { %995 = vst [vmem:[%s2169_s19 + $0x10] sm:$0xff] %v963_v7  ;;  %v964_v0 = vmul.f32 %v1216_v41, %v904_v29  ;;  %1011 = vst [vmem:[%s2169_s19 + $0x90] sm:$0xff] %v979_v24  ;;  %v980_v1 = vmul.f32 %v1264_v44, %v936_v56  ;;  %v1557_v4 = vpop.eup %1556  ;;  %v908_v16 = vmul.f32 0.25, %v1555_v15  ;;  %1578 = vrcp.f32 %v2158_v58 }
 0x15a   : > { %v940_v21 = vmul.f32 0.25, %v1557_v4  ;;  %v1559_v30 = vpop.eup %1558  ;;  %1580 = vrcp.f32 %v563_v47 }
 0x15b   : > { %996 = vst [vmem:[%s2169_s19 + $0x18] sm:$0xff] %v964_v0  ;;  %v1217_v2 = vpop.f32.mrb[8].mxu0  ;;  %1012 = vst [vmem:[%s2169_s19 + $0x98] sm:$0xff] %v980_v1  ;;  %v1265_v11 = vpop.f32.mrb[8].mxu1  ;;  %v910_v50 = vmul.f32 0.25, %v1559_v30  ;;  %1582 = vrcp.f32 %v2160_v59 }
 0x15c   : > { %v1218_v5 = vpop.f32.mrb[9].mxu0  ;;  %v1266_v18 = vpop.f32.mrb[9].mxu1 }
 0x15d   : > { %v1219_v45 = vadd.f32 %v1218_v5, %v1217_v2  ;;  %v1220_v12 = vpop.f32.mrb[10].mxu0  ;;  %v1267_v23 = vadd.f32 %v1266_v18, %v1265_v11  ;;  %v1268_v25 = vpop.f32.mrb[10].mxu1 }
 0x15e   : > { %v1221_v20 = vpop.f32.mrb[11].mxu0  ;;  %v1269_v31 = vpop.f32.mrb[11].mxu1 }
 0x15f   : > { %v965_v22 = vmul.f32 %v1219_v45, %v906_v9  ;;  %v1222_v26 = vadd.f32 %v1221_v20, %v1220_v12  ;;  %v981_v34 = vmul.f32 %v1267_v23, %v938_v3  ;;  %v1270_v8 = vadd.f32 %v1269_v31, %v1268_v25  ;;  %v1561_v37 = vpop.eup %1560  ;;  %v566_v44 = vpop.xlane.xlu0 %565 }
 0x160   : > { %v1563_v39 = vpop.eup %1562  ;;  %v942_v28 = vmul.f32 0.25, %v1561_v37  ;;  %1584 = vrcp.f32 %v566_v44 }
 0x161   : > { %997 = vst [vmem:[%s2169_s19 + $0x20] sm:$0xff] %v965_v22  ;;  %v966_v36 = vmul.f32 %v1222_v26, %v908_v16  ;;  %1013 = vst [vmem:[%s2169_s19 + $0xa0] sm:$0xff] %v981_v34  ;;  %v982_v40 = vmul.f32 %v1270_v8, %v940_v21  ;;  %v1565_v46 = vpop.eup %1564  ;;  %v912_v19 = vmul.f32 0.25, %v1563_v39  ;;  %v569_v16 = vpop.xlane.xlu1 %568  ;;  %1586 = vrcp.f32 %v2162_v60 }
 0x162   : > { %v944_v43 = vmul.f32 0.25, %v1565_v46  ;;  %v1567_v56 = vpop.eup %1566  ;;  %1588 = vrcp.f32 %v569_v16 }
 0x163   : > { %998 = vst [vmem:[%s2169_s19 + $0x28] sm:$0xff] %v966_v36  ;;  %v1223_v42 = vpop.f32.mrb[12].mxu0  ;;  %1014 = vst [vmem:[%s2169_s19 + $0xa8] sm:$0xff] %v982_v40  ;;  %v1271_v52 = vpop.f32.mrb[12].mxu1  ;;  %v914_v57 = vmul.f32 0.25, %v1567_v56  ;;  %1590 = vrcp.f32 %v2164_v62 }
 0x164   : > { %v1224_v48 = vpop.f32.mrb[13].mxu0  ;;  %v1272_v38 = vpop.f32.mrb[13].mxu1 }
 0x165   : > { %v1225_v13 = vadd.f32 %v1224_v48, %v1223_v42  ;;  %v1226_v32 = vpop.f32.mrb[14].mxu0  ;;  %v1273_v10 = vadd.f32 %v1272_v38, %v1271_v52  ;;  %v1274_v29 = vpop.f32.mrb[14].mxu1 }
 0x166   : > { %v1227_v53 = vpop.f32.mrb[15].mxu0  ;;  %v1275_v7 = vpop.f32.mrb[15].mxu1 }
 0x167   : > { %v967_v51 = vmul.f32 %v1225_v13, %v910_v50  ;;  %v1228_v35 = vadd.f32 %v1227_v53, %v1226_v32  ;;  %v983_v14 = vmul.f32 %v1273_v10, %v942_v28  ;;  %v1276_v54 = vadd.f32 %v1275_v7, %v1274_v29  ;;  %v1569_v41 = vpop.eup %1568  ;;  %v572_v34 = vpop.xlane.xlu0 %571 }
 0x168   : > { %v1571_v55 = vpop.eup %1570  ;;  %v946_v15 = vmul.f32 0.25, %v1569_v41  ;;  %v575_v13 = vpop.xlane.xlu1 %574  ;;  %1592 = vrcp.f32 %v572_v34 }
 0x169   : > { %999 = vst [vmem:[%s2169_s19 + $0x30] sm:$0xff] %v967_v51  ;;  %v968_v33 = vmul.f32 %v1228_v35, %v912_v19  ;;  %1015 = vst [vmem:[%s2169_s19 + $0xb0] sm:$0xff] %v983_v14  ;;  %v984_v61 = vmul.f32 %v1276_v54, %v944_v43  ;;  %v1573_v24 = vpop.eup %1572  ;;  %v916_v4 = vmul.f32 0.25, %v1571_v55  ;;  %1594 = vrcp.f32 %v2166_v63 }
 0x16a   : > { %v948_v9 = vmul.f32 0.25, %v1573_v24  ;;  %v1575_v18 = vpop.eup %1574  ;;  %1596 = vrcp.f32 %v575_v13 }
 0x16b   : > { %1000 = vst [vmem:[%s2169_s19 + $0x38] sm:$0xff] %v968_v33  ;;  %v1229_v17 = vpop.f32.mrb[16].mxu0  ;;  %1016 = vst [vmem:[%s2169_s19 + $0xb8] sm:$0xff] %v984_v61  ;;  %v1277_v1 = vpop.f32.mrb[16].mxu1  ;;  %v918_v36 = vmul.f32 0.25, %v1575_v18 }
 0x16c   : > { %v1230_v0 = vpop.f32.mrb[17].mxu0  ;;  %v1278_v5 = vpop.f32.mrb[17].mxu1 }
 0x16d   : > { %v1231_v58 = vadd.f32 %v1230_v0, %v1229_v17  ;;  %v1232_v2 = vpop.f32.mrb[18].mxu0  ;;  %v1279_v11 = vadd.f32 %v1278_v5, %v1277_v1  ;;  %v1280_v45 = vpop.f32.mrb[18].mxu1 }
 0x16e   : > { %v1233_v6 = vpop.f32.mrb[19].mxu0  ;;  %v1281_v20 = vpop.f32.mrb[19].mxu1 }
 0x16f   : > { %v969_v3 = vmul.f32 %v1231_v58, %v914_v57  ;;  %v1234_v12 = vadd.f32 %v1233_v6, %v1232_v2  ;;  %v985_v21 = vmul.f32 %v1279_v11, %v946_v15  ;;  %v1282_v59 = vadd.f32 %v1281_v20, %v1280_v45  ;;  %v1577_v23 = vpop.eup %1576 }
 0x170   : > { %v1579_v25 = vpop.eup %1578  ;;  %v950_v8 = vmul.f32 0.25, %v1577_v23 }
 0x171   : > { %1001 = vst [vmem:[%s2169_s19 + $0x40] sm:$0xff] %v969_v3  ;;  %v970_v22 = vmul.f32 %v1234_v12, %v916_v4  ;;  %1017 = vst [vmem:[%s2169_s19 + $0xc0] sm:$0xff] %v985_v21  ;;  %v986_v26 = vmul.f32 %v1282_v59, %v948_v9  ;;  %v1581_v30 = vpop.eup %1580  ;;  %v920_v40 = vmul.f32 0.25, %v1579_v25 }
 0x172   : > { %v952_v48 = vmul.f32 0.25, %v1581_v30  ;;  %v1583_v32 = vpop.eup %1582 }
 0x173   : > { %1002 = vst [vmem:[%s2169_s19 + $0x48] sm:$0xff] %v970_v22  ;;  %v1235_v27 = vpop.f32.mrb[20].mxu0  ;;  %1018 = vst [vmem:[%s2169_s19 + $0xc8] sm:$0xff] %v986_v26  ;;  %v1283_v37 = vpop.f32.mrb[20].mxu1  ;;  %v922_v56 = vmul.f32 0.25, %v1583_v32 }
 0x174   : > { %v1236_v31 = vpop.f32.mrb[21].mxu0  ;;  %v1284_v42 = vpop.f32.mrb[21].mxu1 }
 0x175   : > { %v1237_v60 = vadd.f32 %v1236_v31, %v1235_v27  ;;  %v1238_v39 = vpop.f32.mrb[22].mxu0  ;;  %v1285_v50 = vadd.f32 %v1284_v42, %v1283_v37  ;;  %v1286_v28 = vpop.f32.mrb[22].mxu1 }
 0x176   : > { %v1239_v46 = vpop.f32.mrb[23].mxu0  ;;  %v1287_v19 = vpop.f32.mrb[23].mxu1 }
 0x177   : > { %v971_v49 = vmul.f32 %v1237_v60, %v918_v36  ;;  %v1240_v52 = vadd.f32 %v1239_v46, %v1238_v39  ;;  %v987_v38 = vmul.f32 %v1285_v50, %v950_v8  ;;  %v1288_v62 = vadd.f32 %v1287_v19, %v1286_v28  ;;  %v1585_v43 = vpop.eup %1584 }
 0x178   : > { %v1587_v51 = vpop.eup %1586  ;;  %v954_v7 = vmul.f32 0.25, %v1585_v43 }
 0x179   : > { %1003 = vst [vmem:[%s2169_s19 + $0x50] sm:$0xff] %v971_v49  ;;  %v972_v53 = vmul.f32 %v1240_v52, %v920_v40  ;;  %1019 = vst [vmem:[%s2169_s19 + $0xd0] sm:$0xff] %v987_v38  ;;  %v988_v10 = vmul.f32 %v1288_v62, %v952_v48  ;;  %v1589_v35 = vpop.eup %1588  ;;  %v924_v54 = vmul.f32 0.25, %v1587_v51 }
 0x17a   : > { %v956_v61 = vmul.f32 0.25, %v1589_v35  ;;  %v1591_v57 = vpop.eup %1590 }
 0x17b   : > { %1004 = vst [vmem:[%s2169_s19 + $0x58] sm:$0xff] %v972_v53  ;;  %v1241_v29 = vpop.f32.mrb[24].mxu0  ;;  %1020 = vst [vmem:[%s2169_s19 + $0xd8] sm:$0xff] %v988_v10  ;;  %v1289_v14 = vpop.f32.mrb[24].mxu1  ;;  %v926_v45 = vmul.f32 0.25, %v1591_v57 }
 0x17c   : > { %v1242_v47 = vpop.f32.mrb[25].mxu0  ;;  %v1290_v41 = vpop.f32.mrb[25].mxu1 }
 0x17d   : > { %v1243_v63 = vadd.f32 %v1242_v47, %v1241_v29  ;;  %v1244_v33 = vpop.f32.mrb[26].mxu0  ;;  %v1291_v24 = vadd.f32 %v1290_v41, %v1289_v14  ;;  %v1292_v0 = vpop.f32.mrb[26].mxu1 }
 0x17e   : > { %v1245_v55 = vpop.f32.mrb[27].mxu0  ;;  %v1293_v15 = vpop.f32.mrb[27].mxu1 }
 0x17f   : > { %v973_v17 = vmul.f32 %v1243_v63, %v922_v56  ;;  %v1246_v44 = vadd.f32 %v1245_v55, %v1244_v33  ;;  %v989_v1 = vmul.f32 %v1291_v24, %v954_v7  ;;  %v1294_v2 = vadd.f32 %v1293_v15, %v1292_v0  ;;  %v1593_v4 = vpop.eup %1592 }
 0x180   : > { %v1595_v5 = vpop.eup %1594  ;;  %v958_v12 = vmul.f32 0.25, %v1593_v4 }
 0x181   : > { %1005 = vst [vmem:[%s2169_s19 + $0x60] sm:$0xff] %v973_v17  ;;  %v974_v58 = vmul.f32 %v1246_v44, %v924_v54  ;;  %1021 = vst [vmem:[%s2169_s19 + $0xe0] sm:$0xff] %v989_v1  ;;  %v990_v6 = vmul.f32 %v1294_v2, %v956_v61  ;;  %v1597_v3 = vpop.eup %1596  ;;  %v928_v21 = vmul.f32 0.25, %v1595_v5 }
 0x182   : > { %v960_v23 = vmul.f32 0.25, %v1597_v3 }
 0x183   : > { %1006 = vst [vmem:[%s2169_s19 + $0x68] sm:$0xff] %v974_v58  ;;  %v1247_v9 = vpop.f32.mrb[28].mxu0  ;;  %1022 = vst [vmem:[%s2169_s19 + $0xe8] sm:$0xff] %v990_v6  ;;  %v1295_v16 = vpop.f32.mrb[28].mxu1 }
 0x184   : > { %v1248_v11 = vpop.f32.mrb[29].mxu0  ;;  %v1296_v22 = vpop.f32.mrb[29].mxu1 }
 0x185   : > { %v1249_v18 = vadd.f32 %v1248_v11, %v1247_v9  ;;  %v1250_v20 = vpop.f32.mrb[30].mxu0  ;;  %v1297_v26 = vadd.f32 %v1296_v22, %v1295_v16  ;;  %v1298_v27 = vpop.f32.mrb[30].mxu1 }
 0x186   : > { %v1251_v59 = vpop.f32.mrb[31].mxu0  ;;  %v1299_v31 = vpop.f32.mrb[31].mxu1 }
 0x187   : > { %v975_v25 = vmul.f32 %v1249_v18, %v926_v45  ;;  %v1252_v30 = vadd.f32 %v1251_v59, %v1250_v20  ;;  %v991_v34 = vmul.f32 %v1297_v26, %v958_v12  ;;  %v1300_v8 = vadd.f32 %v1299_v31, %v1298_v27 }
 0x189   : > { %1007 = vst [vmem:[%s2169_s19 + $0x70] sm:$0xff] %v975_v25  ;;  %v976_v36 = vmul.f32 %v1252_v30, %v928_v21  ;;  %1023 = vst [vmem:[%s2169_s19 + $0xf0] sm:$0xff] %v991_v34  ;;  %v992_v37 = vmul.f32 %v1300_v8, %v960_v23 }
 0x18b   : > { %1008 = vst [vmem:[%s2169_s19 + $0x78] sm:$0xff] %v976_v36  ;;  %1024 = vst [vmem:[%s2169_s19 + $0xf8] sm:$0xff] %v992_v37 }
 0x18c   : > { %1671 = shalt.err (!%p1668_p9)
}
 0x18d   : > { %s1672_s27 = scalar_lea.hbm %s2215_s8, 4096  ;;  %s1676_s25 = scalar_lea.hbm %s2270_s2, 16384 }
 0x18e   : > { %p1673_p5 = scmp.ne.s32.totalorder %s2215_s8, %s1672_s27  ;;  %p1677_p3 = scmp.lt.u32.totalorder %s2215_s8, %s2270_s2 }
 0x18f   : > { %p1678_p4 = scmp.lt.u32.totalorder %s1676_s25, %s1672_s27  ;;  %p1680_p13 = scmp.lt.u32.totalorder %s1672_s27, %s2215_s8 }
 0x190   : > { %p1674_p10 = pnand %p1673_p5, %p2281_p2 }
 0x191   : > { %p1679_p8 = por %p1678_p4, %p1677_p3 }
 0x192   : > { %p1675_p1 = pneg %p1674_p10 }
 0x193   : > { %p1681_p11 = por %p1680_p13, %p1679_p8 }
 0x195   : > { %p1682_p12 = pnand %p1681_p11, %p1675_p1 }
 0x197   : > { %1685 = shalt.err (!%p1682_p12)
}
 0x198   : > { %s1753_s21 = smov 128   ;;  %s1754_s19 = smov 8  }
 0x199   : > { %1321 = dma.vmem_to_hbm [thread:$0]  (%p2281_p2), %s2217_s30, 4096, %s2215_s8, %s1026_s12, %s1753_s21, %s1753_s21, %s1754_s19  }
 0x19a PF: > { %p1335_p6 = scmp.ge.s32.totalorder %s1744_s14, 2  ;;  %s1056_s26 = sand.u32 1, %s1724_s9  }
 0x19b   : > { %p2282_p7 = scmp.ne.s32.totalorder %s2276_s24, 0  ;;  %s1057_s3 = scalar_lea.sflag [#allocation4], %s1056_s26 }
 0x19d   : > { %p1331_p0 = pnand %p1335_p6, %p2282_p7 }
 0x19f   : > { %1719 = dma.done.wait (!%p1331_p0), %s1057_s3, 4096  }
 0x1a0   : > { %1721 = vsyncadd (!%p1331_p0), %s1057_s3, 4294963200  ;;  %s21_s14 = sadd.s32 1, %s1744_s14   ;;  %s2283_s9 = smov %s1728_s10 }
 0x1a1   : > { %p18_p9 = scmp.ge.s32.totalorder %s21_s14, 6   ;;  %s2284_s10 = smov %s1732_s11 }
 0x1a2   : > { %s2285_s11 = smov %s1826_s23  ;;  %s2286_s12 = smov %s1740_s13 }
 0x1a3   : > { %s2287_s13 = smov %s2289_s17  ;;  %20 = sbr.rel (!%p18_p9) target bundleno = 8 (0x8), region = 86 }
 0x1aa   :  { %1062 = vsyncpa [#allocation3], 1 }
 0x1ab   :  { %1064 = vsyncpa [#allocation3 + $0x1], 1 }
 0x1ac   :  { %1065 = vsyncpa [#allocation6], 1 }
 0x1ad   :  { %1067 = vsyncpa [#allocation6 + $0x1], 1 }
 0x1ae   :  { %1068 = vsyncpa [#allocation4], 1 }
 0x1af   :  { %1070 = vsyncpa [#allocation4 + $0x1], 1 }

</bundles_post_ra>
